<compile_context>
chip_gen: v7x
topology: tpu7x:2x2x1
jax: 0.10.0
libtpu: 0.0.40
codegen_flags: <defaults>
</compile_context>

<pallas_src>
import functools
import math

import jax
import jax.numpy as jnp
from jax.experimental import pallas as pl
from jax.experimental.pallas import tpu as pltpu

_LANE = 128
_SUBLANE = 8


def _round_up(x, m):
    return ((x + m - 1) // m) * m


def _make_sae_kernel(n_layers, sigmoid_flags):
    """Kernel over refs: (x, w0, b0, w1, b1, ..., out).

    Weights arrive pre-transposed/padded as (in_pad, out_pad) bf16, biases as
    (1, out_pad) f32.  The input tile is already bf16; intermediate
    activations are f32 and only the MXU operands are cast back to bf16.
    """

    def kernel(*refs):
        x_ref = refs[0]
        out_ref = refs[-1]
        p = refs[1:-1]
        h = x_ref[...]                                      # (TB, d_in_pad) bf16
        for i in range(n_layers):
            w = p[2 * i][...]                               # (in_pad, out_pad) bf16
            b = p[2 * i + 1][...]                           # (1, out_pad) f32
            lhs = h if h.dtype == jnp.bfloat16 else h.astype(jnp.bfloat16)
            h = jnp.dot(lhs, w, preferred_element_type=jnp.float32) + b
            if sigmoid_flags[i]:
                h = jax.nn.sigmoid(h)                       # f32 on VPU/EUP
        out_ref[...] = h.astype(out_ref.dtype)

    return kernel


def prepare_params(enc_params, dec_params):
    """One-time parameter prep, hoisted out of the per-call forward.

    PyTorch-layout (out, in) weights are transposed to (in, out), zero-padded
    in BOTH dims to multiples of 128 and cast to bf16; biases are zero-padded
    to (1, out_pad) f32.  Zero padding in the weight rows keeps lane padding
    correctness-neutral downstream.
    """
    raw = []
    sigmoid_flags = []
    for idx, (w, b) in enumerate(enc_params):               # Sigmoid after all but last
        raw.append((w, b))
        sigmoid_flags.append(idx != len(enc_params) - 1)
    for idx, (w, b) in enumerate(dec_params):               # Sigmoid after all but last
        raw.append((w, b))
        sigmoid_flags.append(idx != len(dec_params) - 1)

    weights = []
    biases = []
    for (w, b) in raw:
        w = jnp.asarray(w, jnp.float32)                     # (out, in)
        b = jnp.asarray(b, jnp.float32)                     # (out,)
        out_dim, in_dim = w.shape
        in_pad = _round_up(in_dim, _LANE)
        out_pad = _round_up(out_dim, _LANE)
        wt = jnp.zeros((in_pad, out_pad), jnp.float32).at[:in_dim, :out_dim].set(w.T)
        bp = jnp.zeros((1, out_pad), jnp.float32).at[0, :out_dim].set(b)
        weights.append(wt.astype(jnp.bfloat16))
        biases.append(bp)

    d_in = int(raw[0][0].shape[1])
    d_out = int(raw[-1][0].shape[0])
    return tuple(weights), tuple(biases), tuple(sigmoid_flags), d_in, d_out


@functools.partial(jax.jit,
                   static_argnames=("sigmoid_flags", "d_in", "d_out", "tile_batch"))
def _forward_impl(x, weights, biases, *, sigmoid_flags, d_in, d_out, tile_batch):
    n_layers = len(weights)
    batch = x.shape[0]
    d_in_pad = weights[0].shape[0]
    d_out_pad = weights[-1].shape[1]

    # Batch tiling: grid over row tiles; params stay resident (block (0, 0)).
    tb = min(int(tile_batch), _round_up(batch, _SUBLANE))
    tb = _round_up(tb, 2 * _SUBLANE)                 # multiple of 16 for bf16 input tile
    batch_pad = _round_up(batch, tb)
    grid = (batch_pad // tb,)

    # Pad + cast the input once in the wrapper (fused into the same XLA program).
    x_pad = jnp.zeros((batch_pad, d_in_pad), jnp.bfloat16)
    x_pad = x_pad.at[:batch, :d_in].set(
        jnp.asarray(x, jnp.float32).astype(jnp.bfloat16))

    kernel = _make_sae_kernel(n_layers, sigmoid_flags)

    inputs = [x_pad]
    in_specs = [pl.BlockSpec((tb, d_in_pad), lambda i: (i, 0))]
    for w, b in zip(weights, biases):
        inputs.append(w)
        inputs.append(b)
        in_specs.append(pl.BlockSpec(w.shape, lambda i: (0, 0)))   # VMEM-resident
        in_specs.append(pl.BlockSpec(b.shape, lambda i: (0, 0)))   # VMEM-resident
    out_spec = pl.BlockSpec((tb, d_out_pad), lambda i: (i, 0))     # lane-dense slab

    # Advisory cost hint for XLA's scheduler.
    flops = 0
    transcendentals = 0
    for w, sig in zip(weights, sigmoid_flags):
        in_pad, out_pad = w.shape
        flops += 2 * batch_pad * in_pad * out_pad
        if sig:
            transcendentals += batch_pad * out_pad
    param_bytes = (sum(int(w.size) * w.dtype.itemsize for w in weights)
                   + sum(int(b.size) * b.dtype.itemsize for b in biases))
    bytes_accessed = int(x_pad.size) * 2 + param_bytes + batch_pad * d_out_pad * 4
    cost = pl.CostEstimate(flops=int(flops),
                           transcendentals=int(transcendentals),
                           bytes_accessed=int(bytes_accessed))

    # VMEM budget: resident params + double-buffered input/output tiles plus
    # live-activation headroom.  Only raise the scoped limit if needed.
    vmem_bytes = (param_bytes
                  + 2 * tb * d_in_pad * 2            # double-buffered bf16 input tile
                  + 2 * tb * d_out_pad * 4           # double-buffered f32 output tile
                  + 2 * tb * max(w.shape[1] for w in weights) * 4)
    compiler_kwargs = {}
    if vmem_bytes > 32 * 1024 * 1024:
        compiler_kwargs["vmem_limit_bytes"] = min(int(vmem_bytes * 3 // 2),
                                                  60 * 1024 * 1024)

    out_padded = pl.pallas_call(
        kernel,
        out_shape=jax.ShapeDtypeStruct((batch_pad, d_out_pad), jnp.float32),
        grid=grid,
        in_specs=in_specs,
        out_specs=out_spec,
        compiler_params=pltpu.CompilerParams(
            dimension_semantics=("parallel",), **compiler_kwargs),
        cost_estimate=cost,
    )(*inputs)

    return out_padded[:batch, :d_out]


def structured_autoencoder_forward(x, prepared, *, tile_batch=256):
    """x: (batch, d_in) f32.  `prepared` comes from prepare_params()."""
    weights, biases, sigmoid_flags, d_in, d_out = prepared
    return _forward_impl(x, weights, biases,
                         sigmoid_flags=sigmoid_flags, d_in=d_in, d_out=d_out,
                         tile_batch=int(tile_batch))


def _init_linear(key, in_dim, out_dim):
    """Deterministic init mimicking nn.Linear's uniform(-1/sqrt(in), 1/sqrt(in))."""
    kw, kb = jax.random.split(key)
    bound = 1.0 / math.sqrt(in_dim)
    w = jax.random.uniform(kw, (out_dim, in_dim), jnp.float32, -bound, bound)
    b = jax.random.uniform(kb, (out_dim,), jnp.float32, -bound, bound)
    return w, b


def _reference_forward(x, enc_params, dec_params, mxu_bf16):
    """Pure-JAX reference; mxu_bf16=True mirrors the kernel's operand quantization."""

    def lin(h, w, b):
        if mxu_bf16:
            return jnp.dot(h.astype(jnp.bfloat16), w.T.astype(jnp.bfloat16),
                           preferred_element_type=jnp.float32) + b
        return h @ w.T + b

    h = jnp.asarray(x, jnp.float32)
    for idx, (w, b) in enumerate(enc_params):
        h = lin(h, w, b)
        if idx != len(enc_params) - 1:
            h = jax.nn.sigmoid(h)
    for idx, (w, b) in enumerate(dec_params):
        h = lin(h, w, b)
        if idx != len(dec_params) - 1:
            h = jax.nn.sigmoid(h)
    return h


if __name__ == "__main__":
    # Shapes consistent with the module: encoder dims [16, 32, 8], decoder dims
    # [8, 32, 16] (mirror).  batch=1024 with tile_batch=256 gives a 4-step grid
    # so the batch pipeline / megacore path is actually exercised.
    encoder_config = {"dimension": [16, 32, 8]}
    decoder_config = {"dimension": [8, 32, 16]}
    batch = 1024

    key = jax.random.PRNGKey(0)
    keys = jax.random.split(key, 8)

    enc_dims = encoder_config["dimension"]
    dec_dims = decoder_config["dimension"]

    enc_params = []
    k_idx = 0
    for i in range(len(enc_dims) - 1):
        enc_params.append(_init_linear(keys[k_idx], enc_dims[i], enc_dims[i + 1]))
        k_idx += 1
    dec_params = []
    for i in range(len(dec_dims) - 1):
        dec_params.append(_init_linear(keys[k_idx], dec_dims[i], dec_dims[i + 1]))
        k_idx += 1

    x = jax.random.normal(keys[k_idx], (batch, enc_dims[0]), jnp.float32)

    prepared = prepare_params(enc_params, dec_params)      # one-time weight prep
    out = structured_autoencoder_forward(x, prepared, tile_batch=256)
    out = jax.block_until_ready(out)

    ref_bf16 = _reference_forward(x, enc_params, dec_params, mxu_bf16=True)
    ref_f32 = _reference_forward(x, enc_params, dec_params, mxu_bf16=False)

    assert out.shape == (batch, dec_dims[-1])
    # Tight check against a reference with identical bf16 MXU-operand quantization.
    assert jnp.allclose(out, ref_bf16, atol=1e-4, rtol=1e-4)
    # Looser check against the full-f32 reference (bf16 operand rounding only).
    assert jnp.allclose(out, ref_f32, atol=5e-2, rtol=5e-2)

    print("KERNEL_OK")
</pallas_src>

<mosaic_0001>
module attributes {stable_mosaic.version = 11 : i64} {
  func.func @kernel(%arg0: i32, %arg1: memref<256x128xbf16, #tpu.memory_space<vmem>>, %arg2: memref<128x128xbf16, #tpu.memory_space<vmem>>, %arg3: memref<1x128xf32, #tpu.memory_space<vmem>>, %arg4: memref<128x128xbf16, #tpu.memory_space<vmem>>, %arg5: memref<1x128xf32, #tpu.memory_space<vmem>>, %arg6: memref<128x128xbf16, #tpu.memory_space<vmem>>, %arg7: memref<1x128xf32, #tpu.memory_space<vmem>>, %arg8: memref<128x128xbf16, #tpu.memory_space<vmem>>, %arg9: memref<1x128xf32, #tpu.memory_space<vmem>>, %arg10: memref<256x128xf32, #tpu.memory_space<vmem>>) attributes {dimension_semantics = [#tpu.dimension_semantics<parallel>], iteration_bounds = array<i64: 4>, scalar_prefetch = 0 : i64, scratch_operands = 0 : i64, tpu.core_type = #tpu.core_type<tc>, window_params = [{transform_indices = @transform_0, window_bounds = array<i64: 256, 128>}, {pipeline_mode = #tpu.pipeline_mode<synchronous>, transform_indices = @transform_1, window_bounds = array<i64: 128, 128>}, {pipeline_mode = #tpu.pipeline_mode<synchronous>, transform_indices = @transform_2, window_bounds = array<i64: 1, 128>}, {pipeline_mode = #tpu.pipeline_mode<synchronous>, transform_indices = @transform_3, window_bounds = array<i64: 128, 128>}, {pipeline_mode = #tpu.pipeline_mode<synchronous>, transform_indices = @transform_4, window_bounds = array<i64: 1, 128>}, {pipeline_mode = #tpu.pipeline_mode<synchronous>, transform_indices = @transform_5, window_bounds = array<i64: 128, 128>}, {pipeline_mode = #tpu.pipeline_mode<synchronous>, transform_indices = @transform_6, window_bounds = array<i64: 1, 128>}, {pipeline_mode = #tpu.pipeline_mode<synchronous>, transform_indices = @transform_7, window_bounds = array<i64: 128, 128>}, {pipeline_mode = #tpu.pipeline_mode<synchronous>, transform_indices = @transform_8, window_bounds = array<i64: 1, 128>}, {transform_indices = @transform_9, window_bounds = array<i64: 256, 128>}]} {
    %c0 = arith.constant 0 : index
    %c0_0 = arith.constant 0 : index
    %0 = vector.load %arg1[%c0, %c0_0] : memref<256x128xbf16, #tpu.memory_space<vmem>>, vector<256x128xbf16>
    %c0_1 = arith.constant 0 : index
    %c0_2 = arith.constant 0 : index
    %1 = vector.load %arg2[%c0_1, %c0_2] : memref<128x128xbf16, #tpu.memory_space<vmem>>, vector<128x128xbf16>
    %c0_3 = arith.constant 0 : index
    %c0_4 = arith.constant 0 : index
    %2 = vector.load %arg3[%c0_3, %c0_4] : memref<1x128xf32, #tpu.memory_space<vmem>>, vector<1x128xf32>
    %cst = arith.constant dense<0.000000e+00> : vector<256x128xf32>
    %3 = tpu.matmul %0, %1, %cst {dimension_numbers = #tpu.dot_dimension_numbers<[1], [0], [0], [1], [0, 0, 1, 1], [], []>} : vector<256x128xbf16>, vector<128x128xbf16>, vector<256x128xf32> -> vector<256x128xf32>
    %4 = vector.broadcast %2 : vector<1x128xf32> to vector<256x128xf32>
    %5 = arith.addf %3, %4 : vector<256x128xf32>
    %6 = arith.negf %5 : vector<256x128xf32>
    %7 = math.exp %6 : vector<256x128xf32>
    %cst_5 = arith.constant 1.000000e+00 : f32
    %8 = vector.broadcast %cst_5 : f32 to vector<256x128xf32>
    %9 = arith.addf %8, %7 : vector<256x128xf32>
    %10 = arith.divf %8, %9 : vector<256x128xf32>
    %c0_6 = arith.constant 0 : index
    %c0_7 = arith.constant 0 : index
    %11 = vector.load %arg4[%c0_6, %c0_7] : memref<128x128xbf16, #tpu.memory_space<vmem>>, vector<128x128xbf16>
    %c0_8 = arith.constant 0 : index
    %c0_9 = arith.constant 0 : index
    %12 = vector.load %arg5[%c0_8, %c0_9] : memref<1x128xf32, #tpu.memory_space<vmem>>, vector<1x128xf32>
    %13 = arith.truncf %10 : vector<256x128xf32> to vector<256x128xbf16>
    %cst_10 = arith.constant dense<0.000000e+00> : vector<256x128xf32>
    %14 = tpu.matmul %13, %11, %cst_10 {dimension_numbers = #tpu.dot_dimension_numbers<[1], [0], [0], [1], [0, 0, 1, 1], [], []>} : vector<256x128xbf16>, vector<128x128xbf16>, vector<256x128xf32> -> vector<256x128xf32>
    %15 = vector.broadcast %12 : vector<1x128xf32> to vector<256x128xf32>
    %16 = arith.addf %14, %15 : vector<256x128xf32>
    %c0_11 = arith.constant 0 : index
    %c0_12 = arith.constant 0 : index
    %17 = vector.load %arg6[%c0_11, %c0_12] : memref<128x128xbf16, #tpu.memory_space<vmem>>, vector<128x128xbf16>
    %c0_13 = arith.constant 0 : index
    %c0_14 = arith.constant 0 : index
    %18 = vector.load %arg7[%c0_13, %c0_14] : memref<1x128xf32, #tpu.memory_space<vmem>>, vector<1x128xf32>
    %19 = arith.truncf %16 : vector<256x128xf32> to vector<256x128xbf16>
    %cst_15 = arith.constant dense<0.000000e+00> : vector<256x128xf32>
    %20 = tpu.matmul %19, %17, %cst_15 {dimension_numbers = #tpu.dot_dimension_numbers<[1], [0], [0], [1], [0, 0, 1, 1], [], []>} : vector<256x128xbf16>, vector<128x128xbf16>, vector<256x128xf32> -> vector<256x128xf32>
    %21 = vector.broadcast %18 : vector<1x128xf32> to vector<256x128xf32>
    %22 = arith.addf %20, %21 : vector<256x128xf32>
    %23 = arith.negf %22 : vector<256x128xf32>
    %24 = math.exp %23 : vector<256x128xf32>
    %cst_16 = arith.constant 1.000000e+00 : f32
    %25 = vector.broadcast %cst_16 : f32 to vector<256x128xf32>
    %26 = arith.addf %25, %24 : vector<256x128xf32>
    %27 = arith.divf %25, %26 : vector<256x128xf32>
    %c0_17 = arith.constant 0 : index
    %c0_18 = arith.constant 0 : index
    %28 = vector.load %arg8[%c0_17, %c0_18] : memref<128x128xbf16, #tpu.memory_space<vmem>>, vector<128x128xbf16>
    %c0_19 = arith.constant 0 : index
    %c0_20 = arith.constant 0 : index
    %29 = vector.load %arg9[%c0_19, %c0_20] : memref<1x128xf32, #tpu.memory_space<vmem>>, vector<1x128xf32>
    %30 = arith.truncf %27 : vector<256x128xf32> to vector<256x128xbf16>
    %cst_21 = arith.constant dense<0.000000e+00> : vector<256x128xf32>
    %31 = tpu.matmul %30, %28, %cst_21 {dimension_numbers = #tpu.dot_dimension_numbers<[1], [0], [0], [1], [0, 0, 1, 1], [], []>} : vector<256x128xbf16>, vector<128x128xbf16>, vector<256x128xf32> -> vector<256x128xf32>
    %32 = vector.broadcast %29 : vector<1x128xf32> to vector<256x128xf32>
    %33 = arith.addf %31, %32 : vector<256x128xf32>
    %c0_22 = arith.constant 0 : index
    %c0_23 = arith.constant 0 : index
    %34 = vector.load %arg10[%c0_22, %c0_23] : memref<256x128xf32, #tpu.memory_space<vmem>>, vector<256x128xf32>
    tpu.vector_store %arg10[%c0_22, %c0_23], %33 {strides = array<i32>} : memref<256x128xf32, #tpu.memory_space<vmem>>, vector<256x128xf32>,
    return
  }
  func.func @transform_0(%arg0: i32) -> (i32, i32) {
    %c0_i32 = arith.constant 0 : i32
    %c0_i32_0 = arith.constant 0 : i32
    return %arg0, %c0_i32 : i32, i32
  }
  func.func @transform_1(%arg0: i32) -> (i32, i32) {
    %c0_i32 = arith.constant 0 : i32
    %c0_i32_0 = arith.constant 0 : i32
    %c0_i32_1 = arith.constant 0 : i32
    return %c0_i32, %c0_i32_0 : i32, i32
  }
  func.func @transform_2(%arg0: i32) -> (i32, i32) {
    %c0_i32 = arith.constant 0 : i32
    %c0_i32_0 = arith.constant 0 : i32
    %c0_i32_1 = arith.constant 0 : i32
    return %c0_i32, %c0_i32_0 : i32, i32
  }
  func.func @transform_3(%arg0: i32) -> (i32, i32) {
    %c0_i32 = arith.constant 0 : i32
    %c0_i32_0 = arith.constant 0 : i32
    %c0_i32_1 = arith.constant 0 : i32
    return %c0_i32, %c0_i32_0 : i32, i32
  }
  func.func @transform_4(%arg0: i32) -> (i32, i32) {
    %c0_i32 = arith.constant 0 : i32
    %c0_i32_0 = arith.constant 0 : i32
    %c0_i32_1 = arith.constant 0 : i32
    return %c0_i32, %c0_i32_0 : i32, i32
  }
  func.func @transform_5(%arg0: i32) -> (i32, i32) {
    %c0_i32 = arith.constant 0 : i32
    %c0_i32_0 = arith.constant 0 : i32
    %c0_i32_1 = arith.constant 0 : i32
    return %c0_i32, %c0_i32_0 : i32, i32
  }
  func.func @transform_6(%arg0: i32) -> (i32, i32) {
    %c0_i32 = arith.constant 0 : i32
    %c0_i32_0 = arith.constant 0 : i32
    %c0_i32_1 = arith.constant 0 : i32
    return %c0_i32, %c0_i32_0 : i32, i32
  }
  func.func @transform_7(%arg0: i32) -> (i32, i32) {
    %c0_i32 = arith.constant 0 : i32
    %c0_i32_0 = arith.constant 0 : i32
    %c0_i32_1 = arith.constant 0 : i32
    return %c0_i32, %c0_i32_0 : i32, i32
  }
  func.func @transform_8(%arg0: i32) -> (i32, i32) {
    %c0_i32 = arith.constant 0 : i32
    %c0_i32_0 = arith.constant 0 : i32
    %c0_i32_1 = arith.constant 0 : i32
    return %c0_i32, %c0_i32_0 : i32, i32
  }
  func.func @transform_9(%arg0: i32) -> (i32, i32) {
    %c0_i32 = arith.constant 0 : i32
    %c0_i32_0 = arith.constant 0 : i32
    return %arg0, %c0_i32 : i32, i32
  }
}

</mosaic_0001>

<bundles_post_ra>
// kernel: _forward_impl.1
= control target key start
LH: loop header
LB: loop body
LE: loop exit
PB: predicated region body
PF: predicated region fallthrough
CT: control target
= control target key end

     0   :  { %s2698_s30 = smov 0   ;;  %s3015_s0 = inlined_call_operand.vmem [shape: bf16[1024,128], index: 0, kind: input, shape index: {}]   ;;  %s3016_s1 = inlined_call_operand.vmem [shape: bf16[128,128], index: 1, kind: input, shape index: {}]   ;;  %s3017_s2 = inlined_call_operand.vmem [shape: f32[1,128], index: 2, kind: input, shape index: {}]   ;;  %s3018_s3 = inlined_call_operand.vmem [shape: bf16[128,128], index: 3, kind: input, shape index: {}]   ;;  %s3019_s4 = inlined_call_operand.vmem [shape: f32[1,128], index: 4, kind: input, shape index: {}]   ;;  %s3020_s5 = inlined_call_operand.vmem [shape: bf16[128,128], index: 5, kind: input, shape index: {}]   ;;  %s3021_s6 = inlined_call_operand.vmem [shape: f32[1,128], index: 6, kind: input, shape index: {}]   ;;  %s3022_s7 = inlined_call_operand.vmem [shape: bf16[128,128], index: 7, kind: input, shape index: {}]   ;;  %s3023_s8 = inlined_call_operand.vmem [shape: f32[1,128], index: 8, kind: input, shape index: {}]   ;;  %s3024_s9 = inlined_call_operand.vmem [shape: f32[1024,128], index: 9, kind: output, shape index: {}]  }
   0x1 LB: > { %s1913_s10 = sadd.s32 4294967295, %s2646_s30   ;;  %p1917_p0 = scmp.ge.s32.totalorder %s2646_s30, 1  ;;  %s2646_s30 = sphi %s2698_s30, %s19_s30  }
   0x2   : > { %p288_p1 = scmp.lt.s32.totalorder %s2646_s30, 5 }
   0x4   : > { %p289_p2 = pnand %p1917_p0, %p288_p1 }
   0x5   : > { %v2336_v0 = vld [vmem:[%s3016_s1] sm:$0xff] (!%p289_p2)   ;;  %s1918_s13 = sshll.u32 (!%p289_p2), %s1913_s10, 5  ;;  %v2337_v1 = vld [vmem:[%s3016_s1 + $0x8] sm:$0xff] (!%p289_p2)   ;;  %v2338_v2 = vld [vmem:[%s3016_s1 + $0x10] sm:$0xff] (!%p289_p2)  }
   0x6   : > { %292 = sbr.rel (%p289_p2) target bundleno = 1027 (0x403), region = 56  ;;  %p325_p3 = scmp.lt.s32.totalorder (!%p289_p2), %s1918_s13, 127  ;;  %2136 = vmatprep.subr.bf16.mxu0 (!%p289_p2), %v2336_v0  ;;  %v2339_v3 = vld [vmem:[%s3016_s1 + $0x18] sm:$0xff] (!%p289_p2)   ;;  %v2340_v5 = vld [vmem:[%s3016_s1 + $0x20] sm:$0xff] (!%p289_p2)   ;;  %v2341_v6 = vld [vmem:[%s3016_s1 + $0x28] sm:$0xff] (!%p289_p2)  }
   0x7   : > { %2137 = vmatpush3.bf16.msra.mxu0 (!%p289_p2), %v2336_v0  ;;  %v2342_v7 = vld [vmem:[%s3016_s1 + $0x30] sm:$0xff] (!%p289_p2)   ;;  %v2343_v8 = vld [vmem:[%s3016_s1 + $0x38] sm:$0xff] (!%p289_p2)   ;;  %v2360_v24 = vld [vmem:[%s3018_s3] sm:$0xff] (!%p289_p2)  }
   0x8   : > { %2138 = vmatprep.subr.bf16.mxu0 (!%p289_p2), %v2337_v1  ;;  %2184 = vmatprep.subr.bf16.mxu1 (!%p289_p2), %v2360_v24  ;;  %v2361_v25 = vld [vmem:[%s3018_s3 + $0x8] sm:$0xff] (!%p289_p2)   ;;  %v2362_v26 = vld [vmem:[%s3018_s3 + $0x10] sm:$0xff] (!%p289_p2)   ;;  %v2363_v27 = vld [vmem:[%s3018_s3 + $0x18] sm:$0xff] (!%p289_p2)  }
   0x9   : > { %2185 = vmatpush3.bf16.msra.mxu1 (!%p289_p2), %v2360_v24  ;;  %v2364_v28 = vld [vmem:[%s3018_s3 + $0x20] sm:$0xff] (!%p289_p2)   ;;  %v2365_v29 = vld [vmem:[%s3018_s3 + $0x28] sm:$0xff] (!%p289_p2)   ;;  %v2366_v30 = vld [vmem:[%s3018_s3 + $0x30] sm:$0xff] (!%p289_p2)  }
   0xa   : > { %2186 = vmatprep.subr.bf16.mxu1 (!%p289_p2), %v2361_v25  ;;  %v2367_v31 = vld [vmem:[%s3018_s3 + $0x38] sm:$0xff] (!%p289_p2)   ;;  %v2368_v32 = vld [vmem:[%s3020_s5] sm:$0xff] (!%p289_p2)   ;;  %v2369_v33 = vld [vmem:[%s3020_s5 + $0x8] sm:$0xff] (!%p289_p2)  }
   0xb   : > { %2139 = vmatpush3.bf16.msra.mxu0 (!%p289_p2), %v2337_v1  ;;  %v2370_v34 = vld [vmem:[%s3020_s5 + $0x10] sm:$0xff] (!%p289_p2)   ;;  %v2371_v35 = vld [vmem:[%s3020_s5 + $0x18] sm:$0xff] (!%p289_p2)   ;;  %v2372_v36 = vld [vmem:[%s3020_s5 + $0x20] sm:$0xff] (!%p289_p2)  }
   0xc   : > { %2140 = vmatprep.subr.bf16.mxu0 (!%p289_p2), %v2338_v2  ;;  %v2373_v37 = vld [vmem:[%s3020_s5 + $0x28] sm:$0xff] (!%p289_p2)   ;;  %v2374_v38 = vld [vmem:[%s3020_s5 + $0x30] sm:$0xff] (!%p289_p2)   ;;  %v2802_v39 = vld [vmem:[%s3017_s2] ss:$0 sm:$0xff] (!%p289_p2) }
   0xd   : > { %s3026_s13 = smov (!%p325_p3, %s1918_s13), 127  ;;  %2187 = vmatpush3.bf16.msra.mxu1 %v2361_v25 }
   0xe   : > { %s1919_s18 = sshll.u32 %s3026_s13, 2  ;;  %2188 = vmatprep.subr.bf16.mxu1 %v2362_v26  ;;  %s1921_s29 = sshll.u32 %s3026_s13, 3 }
   0xf   : > { %s2721_s21 = scalar_lea.vmem %s3015_s0, %s1919_s18  ;;  %2141 = vmatpush3.bf16.msra.mxu0 %v2338_v2  ;;  %s2946_s15 = scalar_lea.vmem %s3024_s9, %s1921_s29 }
  0x10   : > { %v2344_v4 = vld [vmem:[%s2721_s21] sm:$0xff]   ;;  %2142 = vmatprep.subr.bf16.mxu0 %v2339_v3  ;;  %v2345_v9 = vld [vmem:[%s2721_s21 + $0x8] sm:$0xff]   ;;  %v2346_v10 = vld [vmem:[%s2721_s21 + $0x10] sm:$0xff]  }
  0x11   : > { %2152 = vmatprep.mubr.bf16.mxu0 %v2344_v4  ;;  %v2347_v11 = vld [vmem:[%s2721_s21 + $0x18] sm:$0xff]   ;;  %v2348_v12 = vld [vmem:[%s2721_s21 + $0x20] sm:$0xff]   ;;  %v2349_v13 = vld [vmem:[%s2721_s21 + $0x28] sm:$0xff]   ;;  %2189 = vmatpush3.bf16.msra.mxu1 %v2362_v26 }
  0x12   : > { %v2350_v14 = vld [vmem:[%s2721_s21 + $0x30] sm:$0xff]   ;;  %v2351_v15 = vld [vmem:[%s2721_s21 + $0x38] sm:$0xff]   ;;  %v2352_v16 = vld [vmem:[%s2721_s21 + $0x40] sm:$0xff]   ;;  %2190 = vmatprep.subr.bf16.mxu1 %v2363_v27 }
  0x13   : > { %2143 = vmatpush3.bf16.msra.mxu0 %v2339_v3  ;;  %v2353_v17 = vld [vmem:[%s2721_s21 + $0x48] sm:$0xff]   ;;  %v2354_v18 = vld [vmem:[%s2721_s21 + $0x50] sm:$0xff]   ;;  %v2355_v19 = vld [vmem:[%s2721_s21 + $0x58] sm:$0xff]  }
  0x14   : > { %2144 = vmatprep.subr.bf16.mxu0 %v2340_v5  ;;  %v2356_v20 = vld [vmem:[%s2721_s21 + $0x60] sm:$0xff]   ;;  %v2357_v21 = vld [vmem:[%s2721_s21 + $0x68] sm:$0xff]   ;;  %v2358_v22 = vld [vmem:[%s2721_s21 + $0x70] sm:$0xff]  }
  0x15   : > { %v2359_v23 = vld [vmem:[%s2721_s21 + $0x78] sm:$0xff]   ;;  %2191 = vmatpush3.bf16.msra.mxu1 %v2363_v27 }
  0x16   : > { %2192 = vmatprep.subr.bf16.mxu1 %v2364_v28 }
  0x17   : > { %2145 = vmatpush3.bf16.msra.mxu0 %v2340_v5 }
  0x18   : > { %2146 = vmatprep.subr.bf16.mxu0 %v2341_v6 }
  0x19   : > { %2193 = vmatpush3.bf16.msra.mxu1 %v2364_v28 }
  0x1a   : > { %2194 = vmatprep.subr.bf16.mxu1 %v2365_v29 }
  0x1b   : > { %2147 = vmatpush3.bf16.msra.mxu0 %v2341_v6 }
  0x1c   : > { %2148 = vmatprep.subr.bf16.mxu0 %v2342_v7 }
  0x1d   : > { %2195 = vmatpush3.bf16.msra.mxu1 %v2365_v29 }
  0x1e   : > { %2196 = vmatprep.subr.bf16.mxu1 %v2366_v30 }
  0x1f   : > { %2149 = vmatpush3.bf16.msra.mxu0 %v2342_v7 }
  0x20   : > { %2150 = vmatprep.subr.bf16.mxu0 %v2343_v8 }
  0x21   : > { %2197 = vmatpush3.bf16.msra.mxu1 %v2366_v30 }
  0x22   : > { %2198 = vmatprep.subr.bf16.mxu1 %v2367_v31 }
  0x23   : > { %2151 = vmatpush3.bf16.msra.mxu0 %v2343_v8 }
  0x24   : > { %2232 = vmatprep.subr.bf16.mxu0 %v2368_v32 }
  0x25   : > { %2199 = vmatpush3.bf16.msra.mxu1 %v2367_v31 }
  0x26   : > { %2153 = vmatmul.mubr.bf16.vlgmr.msra.gmra.mrb[0].mxu0 %v2345_v9 }
  0x27   : > { %2156 = vmatprep.mubr.bf16.mxu0 %v2346_v10  ;;  %2233 = vmatpush3.bf16.msra.mxu0 %v2368_v32 }
  0x28   : > { %2234 = vmatprep.subr.bf16.mxu0 %v2369_v33 }
  0x2b   : > { %2235 = vmatpush3.bf16.msra.mxu0 %v2369_v33 }
  0x2c   : > { %2236 = vmatprep.subr.bf16.mxu0 %v2370_v34 }
  0x2e   : > { %2157 = vmatmul.mubr.bf16.gmra.mrb[4].mxu0 %v2347_v11 }
  0x2f   : > { %2160 = vmatprep.mubr.bf16.mxu0 %v2348_v12  ;;  %2237 = vmatpush3.bf16.msra.mxu0 %v2370_v34 }
  0x30   : > { %2238 = vmatprep.subr.bf16.mxu0 %v2371_v35 }
  0x33   : > { %2239 = vmatpush3.bf16.msra.mxu0 %v2371_v35 }
  0x34   : > { %2240 = vmatprep.subr.bf16.mxu0 %v2372_v36 }
  0x36   : > { %2161 = vmatmul.mubr.bf16.gmra.mrb[8].mxu0 %v2349_v13 }
  0x37   : > { %2164 = vmatprep.mubr.bf16.mxu0 %v2350_v14  ;;  %2241 = vmatpush3.bf16.msra.mxu0 %v2372_v36 }
  0x38   : > { %2242 = vmatprep.subr.bf16.mxu0 %v2373_v37 }
  0x3b   : > { %2243 = vmatpush3.bf16.msra.mxu0 %v2373_v37 }
  0x3c   : > { %2244 = vmatprep.subr.bf16.mxu0 %v2374_v38 }
  0x3e   : > { %2165 = vmatmul.mubr.bf16.gmra.mrb[12].mxu0 %v2351_v15 }
  0x3f   : > { %2168 = vmatprep.mubr.bf16.mxu0 %v2352_v16  ;;  %2245 = vmatpush3.bf16.msra.mxu0 %v2374_v38 }
  0x46   : > { %2169 = vmatmul.mubr.bf16.gmra.mrb[16].mxu0 %v2353_v17 }
  0x47   : > { %2172 = vmatprep.mubr.bf16.mxu0 %v2354_v18 }
  0x4e   : > { %2173 = vmatmul.mubr.bf16.gmra.mrb[20].mxu0 %v2355_v19 }
  0x4f   : > { %2176 = vmatprep.mubr.bf16.mxu0 %v2356_v20 }
  0x56   : > { %2177 = vmatmul.mubr.bf16.gmra.mrb[24].mxu0 %v2357_v21 }
  0x57   : > { %2180 = vmatprep.mubr.bf16.mxu0 %v2358_v22 }
  0x5e   : > { %2181 = vmatmul.mubr.bf16.gmra.mrb[28].mxu0 %v2359_v23 }
  0xf9   : > { %v2154_v40 = vpop.f32.mrb[0].mxu0 }
  0xfa   : > { %v579_v41 = vadd.f32 %v2154_v40, %v2802_v39  ;;  %v570_v42 = vpop.f32.mrb[1].mxu0 }
  0xfb   : > { %v571_v43 = vadd.f32 %v2802_v39, %v570_v42  ;;  %v2155_v44 = vpop.f32.mrb[2].mxu0 }
  0xfc   : > { %v1949_v45 = vmul.f32 -1.442695, %v579_v41  ;;  %v582_v46 = vadd.f32 %v2155_v44, %v2802_v39  ;;  %v573_v47 = vpop.f32.mrb[3].mxu0 }
  0xfd   : > { %v1947_v48 = vmul.f32 -1.442695, %v571_v43  ;;  %v574_v49 = vadd.f32 %v2802_v39, %v573_v47 }
  0xfe   : > { %2384 = vpow2.f32 %v1949_v45  ;;  %v1950_v50 = vmul.f32 -1.442695, %v582_v46 }
  0xff   : > { %2386 = vpow2.f32 %v1947_v48  ;;  %v1948_v51 = vmul.f32 -1.442695, %v574_v49 }
 0x100   : > { %2388 = vpow2.f32 %v1950_v50 }
 0x101   : > { %2390 = vpow2.f32 %v1948_v51  ;;  %v2158_v52 = vpop.f32.mrb[4].mxu0 }
 0x102   : > { %v595_v53 = vadd.f32 %v2158_v52, %v2802_v39  ;;  %v586_v54 = vpop.f32.mrb[5].mxu0 }
 0x103   : > { %v587_v55 = vadd.f32 %v2802_v39, %v586_v54  ;;  %v2159_v56 = vpop.f32.mrb[6].mxu0 }
 0x104   : > { %v1953_v57 = vmul.f32 -1.442695, %v595_v53  ;;  %v598_v58 = vadd.f32 %v2159_v56, %v2802_v39  ;;  %v589_v59 = vpop.f32.mrb[7].mxu0 }
 0x105   : > { %v1951_v60 = vmul.f32 -1.442695, %v587_v55  ;;  %v590_v61 = vadd.f32 %v2802_v39, %v589_v59 }
 0x106   : > { %2392 = vpow2.f32 %v1953_v57  ;;  %v1954_v62 = vmul.f32 -1.442695, %v598_v58 }
 0x107   : > { %2394 = vpow2.f32 %v1951_v60  ;;  %v1952_v63 = vmul.f32 -1.442695, %v590_v61 }
 0x108   : > { %v2385_v0 = vpop.eup %2384  ;;  %2396 = vpow2.f32 %v1954_v62 }
 0x109   : > { %v2387_v1 = vpop.eup %2386  ;;  %v795_v2 = vadd.f32 1.0, %v2385_v0  ;;  %2398 = vpow2.f32 %v1952_v63  ;;  %v2162_v3 = vpop.f32.mrb[8].mxu0 }
 0x10a   : > { %v2389_v4 = vpop.eup %2388  ;;  %v793_v5 = vadd.f32 1.0, %v2387_v1  ;;  %v611_v6 = vadd.f32 %v2162_v3, %v2802_v39  ;;  %v602_v7 = vpop.f32.mrb[9].mxu0 }
 0x10b   : > { %v2391_v8 = vpop.eup %2390  ;;  %2400 = vrcp.f32 %v795_v2  ;;  %v796_v9 = vadd.f32 1.0, %v2389_v4  ;;  %v603_v10 = vadd.f32 %v2802_v39, %v602_v7  ;;  %v2163_v11 = vpop.f32.mrb[10].mxu0 }
 0x10c   : > { %2402 = vrcp.f32 %v793_v5  ;;  %v794_v12 = vadd.f32 1.0, %v2391_v8  ;;  %v1957_v13 = vmul.f32 -1.442695, %v611_v6  ;;  %v614_v14 = vadd.f32 %v2163_v11, %v2802_v39  ;;  %v605_v15 = vpop.f32.mrb[11].mxu0 }
 0x10d   : > { %2404 = vrcp.f32 %v796_v9  ;;  %v1955_v16 = vmul.f32 -1.442695, %v603_v10  ;;  %v606_v17 = vadd.f32 %v2802_v39, %v605_v15 }
 0x10e   : > { %2406 = vrcp.f32 %v794_v12  ;;  %v1958_v18 = vmul.f32 -1.442695, %v614_v14 }
 0x10f   : > { %2408 = vpow2.f32 %v1957_v13  ;;  %v1956_v19 = vmul.f32 -1.442695, %v606_v17 }
 0x110   : > { %v2393_v20 = vpop.eup %2392  ;;  %2410 = vpow2.f32 %v1955_v16 }
 0x111   : > { %v2395_v21 = vpop.eup %2394  ;;  %v799_v22 = vadd.f32 1.0, %v2393_v20  ;;  %2412 = vpow2.f32 %v1958_v18  ;;  %v2166_v23 = vpop.f32.mrb[12].mxu0 }
 0x112   : > { %v2397_v24 = vpop.eup %2396  ;;  %v797_v25 = vadd.f32 1.0, %v2395_v21  ;;  %2414 = vpow2.f32 %v1956_v19  ;;  %v627_v26 = vadd.f32 %v2166_v23, %v2802_v39  ;;  %v618_v27 = vpop.f32.mrb[13].mxu0 }
 0x113   : > { %v2399_v28 = vpop.eup %2398  ;;  %2416 = vrcp.f32 %v799_v22  ;;  %v800_v29 = vadd.f32 1.0, %v2397_v24  ;;  %v619_v30 = vadd.f32 %v2802_v39, %v618_v27  ;;  %v2167_v31 = vpop.f32.mrb[14].mxu0 }
 0x114   : > { %2418 = vrcp.f32 %v797_v25  ;;  %v798_v32 = vadd.f32 1.0, %v2399_v28  ;;  %v1961_v33 = vmul.f32 -1.442695, %v627_v26  ;;  %v630_v34 = vadd.f32 %v2167_v31, %v2802_v39  ;;  %v621_v35 = vpop.f32.mrb[15].mxu0 }
 0x115   : > { %v2401_v36 = vpop.eup %2400  ;;  %2420 = vrcp.f32 %v800_v29  ;;  %v1959_v37 = vmul.f32 -1.442695, %v619_v30  ;;  %v622_v38 = vadd.f32 %v2802_v39, %v621_v35 }
 0x116   : > { %v2403_v40 = vpop.eup %2402  ;;  %2422 = vrcp.f32 %v798_v32  ;;  %v1962_v41 = vmul.f32 -1.442695, %v630_v34 }
 0x117   : > { %v2405_v42 = vpop.eup %2404  ;;  %2424 = vpow2.f32 %v1961_v33  ;;  %v1960_v43 = vmul.f32 -1.442695, %v622_v38 }
 0x118   : > { %v2407_v44 = vpop.eup %2406  ;;  %2426 = vpow2.f32 %v1959_v37  ;;  %v907_v45 = vpack.c.bf16 %v2405_v42, %v2401_v36 }
 0x119   : > { %v2409_v46 = vpop.eup %2408  ;;  %2428 = vpow2.f32 %v1962_v41  ;;  %v2170_v47 = vpop.f32.mrb[16].mxu0  ;;  %v906_v48 = vpack.c.bf16 %v2407_v44, %v2403_v40 }
 0x11a   : > { %v2411_v49 = vpop.eup %2410  ;;  %v803_v50 = vadd.f32 1.0, %v2409_v46  ;;  %2430 = vpow2.f32 %v1960_v43  ;;  %v643_v51 = vadd.f32 %v2170_v47, %v2802_v39  ;;  %v634_v52 = vpop.f32.mrb[17].mxu0 }
 0x11b   : > { %v2413_v53 = vpop.eup %2412  ;;  %v801_v54 = vadd.f32 1.0, %v2411_v49  ;;  %v635_v55 = vadd.f32 %v2802_v39, %v634_v52  ;;  %v2171_v56 = vpop.f32.mrb[18].mxu0  ;;  %2200 = vmatprep.mubr.bf16.mxu1 %v906_v48 }
 0x11c   : > { %v2415_v57 = vpop.eup %2414  ;;  %2432 = vrcp.f32 %v803_v50  ;;  %v804_v58 = vadd.f32 1.0, %v2413_v53  ;;  %v1965_v59 = vmul.f32 -1.442695, %v643_v51  ;;  %v646_v60 = vadd.f32 %v2171_v56, %v2802_v39  ;;  %v637_v61 = vpop.f32.mrb[19].mxu0  ;;  %2201 = vmatmul.mubr.bf16.vlgmr.msra.gmra.mrb[0].mxu1 %v907_v45 }
 0x11d   : > { %v2417_v62 = vpop.eup %2416  ;;  %2434 = vrcp.f32 %v801_v54  ;;  %v802_v63 = vadd.f32 1.0, %v2415_v57  ;;  %v1963_v0 = vmul.f32 -1.442695, %v635_v55  ;;  %v638_v1 = vadd.f32 %v2802_v39, %v637_v61 }
 0x11e   : > { %v2419_v2 = vpop.eup %2418  ;;  %2436 = vrcp.f32 %v804_v58  ;;  %v1966_v3 = vmul.f32 -1.442695, %v646_v60 }
 0x11f   : > { %v2421_v4 = vpop.eup %2420  ;;  %2438 = vrcp.f32 %v802_v63  ;;  %v1964_v5 = vmul.f32 -1.442695, %v638_v1 }
 0x120   : > { %v2423_v6 = vpop.eup %2422  ;;  %2440 = vpow2.f32 %v1965_v59  ;;  %v909_v7 = vpack.c.bf16 %v2421_v4, %v2417_v62 }
 0x121   : > { %v2425_v8 = vpop.eup %2424  ;;  %2442 = vpow2.f32 %v1963_v0  ;;  %v2174_v9 = vpop.f32.mrb[20].mxu0  ;;  %v908_v10 = vpack.c.bf16 %v2423_v6, %v2419_v2 }
 0x122   : > { %v2427_v11 = vpop.eup %2426  ;;  %v807_v12 = vadd.f32 1.0, %v2425_v8  ;;  %2444 = vpow2.f32 %v1966_v3  ;;  %v659_v13 = vadd.f32 %v2174_v9, %v2802_v39  ;;  %v650_v14 = vpop.f32.mrb[21].mxu0 }
 0x123   : > { %v2429_v15 = vpop.eup %2428  ;;  %v805_v16 = vadd.f32 1.0, %v2427_v11  ;;  %2446 = vpow2.f32 %v1964_v5  ;;  %v651_v17 = vadd.f32 %v2802_v39, %v650_v14  ;;  %v2175_v18 = vpop.f32.mrb[22].mxu0  ;;  %2204 = vmatprep.mubr.bf16.mxu1 %v908_v10 }
 0x124   : > { %v2431_v19 = vpop.eup %2430  ;;  %2448 = vrcp.f32 %v807_v12  ;;  %v808_v20 = vadd.f32 1.0, %v2429_v15  ;;  %v1969_v21 = vmul.f32 -1.442695, %v659_v13  ;;  %v662_v22 = vadd.f32 %v2175_v18, %v2802_v39  ;;  %v653_v23 = vpop.f32.mrb[23].mxu0  ;;  %2205 = vmatmul.mubr.bf16.gmra.mrb[4].mxu1 %v909_v7 }
 0x125   : > { %2450 = vrcp.f32 %v805_v16  ;;  %v806_v24 = vadd.f32 1.0, %v2431_v19  ;;  %v1967_v25 = vmul.f32 -1.442695, %v651_v17  ;;  %v654_v26 = vadd.f32 %v2802_v39, %v653_v23 }
 0x126   : > { %v2433_v27 = vpop.eup %2432  ;;  %2452 = vrcp.f32 %v808_v20  ;;  %v1970_v28 = vmul.f32 -1.442695, %v662_v22 }
 0x127   : > { %v2435_v29 = vpop.eup %2434  ;;  %2454 = vrcp.f32 %v806_v24  ;;  %v1968_v30 = vmul.f32 -1.442695, %v654_v26 }
 0x128   : > { %v2437_v31 = vpop.eup %2436  ;;  %2456 = vpow2.f32 %v1969_v21 }
 0x129   : > { %v2439_v32 = vpop.eup %2438  ;;  %2458 = vpow2.f32 %v1967_v25  ;;  %v2178_v33 = vpop.f32.mrb[24].mxu0  ;;  %v911_v34 = vpack.c.bf16 %v2437_v31, %v2433_v27 }
 0x12a   : > { %v2441_v35 = vpop.eup %2440  ;;  %2460 = vpow2.f32 %v1970_v28  ;;  %v675_v36 = vadd.f32 %v2178_v33, %v2802_v39  ;;  %v666_v37 = vpop.f32.mrb[25].mxu0  ;;  %v910_v38 = vpack.c.bf16 %v2439_v32, %v2435_v29 }
 0x12b   : > { %v2443_v40 = vpop.eup %2442  ;;  %v811_v41 = vadd.f32 1.0, %v2441_v35  ;;  %2462 = vpow2.f32 %v1968_v30  ;;  %v667_v42 = vadd.f32 %v2802_v39, %v666_v37  ;;  %v2179_v43 = vpop.f32.mrb[26].mxu0 }
 0x12c   : > { %v2445_v44 = vpop.eup %2444  ;;  %v809_v45 = vadd.f32 1.0, %v2443_v40  ;;  %v678_v46 = vadd.f32 %v2179_v43, %v2802_v39  ;;  %2208 = vmatprep.mubr.bf16.mxu1 %v910_v38  ;;  %v669_v47 = vpop.f32.mrb[27].mxu0  ;;  %v1973_v50 = vmul.f32 -1.442695, %v675_v36 }
 0x12d   : > { %v2447_v48 = vpop.eup %2446  ;;  %2464 = vrcp.f32 %v811_v41  ;;  %v812_v49 = vadd.f32 1.0, %v2445_v44  ;;  %v670_v51 = vadd.f32 %v2802_v39, %v669_v47  ;;  %2209 = vmatmul.mubr.bf16.gmra.mrb[8].mxu1 %v911_v34  ;;  %v1971_v54 = vmul.f32 -1.442695, %v667_v42 }
 0x12e   : > { %v2449_v52 = vpop.eup %2448  ;;  %2466 = vrcp.f32 %v809_v45  ;;  %v810_v53 = vadd.f32 1.0, %v2447_v48  ;;  %v1974_v56 = vmul.f32 -1.442695, %v678_v46 }
 0x12f   : > { %v2451_v55 = vpop.eup %2450  ;;  %2468 = vrcp.f32 %v812_v49  ;;  %v1972_v58 = vmul.f32 -1.442695, %v670_v51 }
 0x130   : > { %v2453_v57 = vpop.eup %2452  ;;  %2470 = vrcp.f32 %v810_v53 }
 0x131   : > { %v2455_v59 = vpop.eup %2454  ;;  %2472 = vpow2.f32 %v1973_v50  ;;  %v2182_v60 = vpop.f32.mrb[28].mxu0  ;;  %v913_v61 = vpack.c.bf16 %v2453_v57, %v2449_v52 }
 0x132   : > { %v2457_v62 = vpop.eup %2456  ;;  %2474 = vpow2.f32 %v1971_v54  ;;  %v691_v63 = vadd.f32 %v2182_v60, %v2802_v39  ;;  %v682_v0 = vpop.f32.mrb[29].mxu0  ;;  %v912_v1 = vpack.c.bf16 %v2455_v59, %v2451_v55  ;;  %v2376_v59 = vld [vmem:[%s3022_s7] sm:$0xff]   ;;  %v2377_v60 = vld [vmem:[%s3022_s7 + $0x8] sm:$0xff]  }
 0x133   : > { %v2459_v2 = vpop.eup %2458  ;;  %v815_v3 = vadd.f32 1.0, %v2457_v62  ;;  %2476 = vpow2.f32 %v1974_v56  ;;  %v683_v4 = vadd.f32 %v2802_v39, %v682_v0  ;;  %v2183_v5 = vpop.f32.mrb[30].mxu0  ;;  %2280 = vmatprep.subr.bf16.mxu1 %v2376_v59  ;;  %v2379_v62 = vld [vmem:[%s3022_s7 + $0x18] sm:$0xff]   ;;  %v2854_v0 = vld [vmem:[%s3019_s4] ss:$0 sm:$0xff] }
 0x134   : > { %v2461_v6 = vpop.eup %2460  ;;  %v813_v7 = vadd.f32 1.0, %v2459_v2  ;;  %2478 = vpow2.f32 %v1972_v58  ;;  %v694_v8 = vadd.f32 %v2183_v5, %v2802_v39  ;;  %2212 = vmatprep.mubr.bf16.mxu1 %v912_v1  ;;  %v685_v9 = vpop.f32.mrb[31].mxu0  ;;  %v1977_v12 = vmul.f32 -1.442695, %v691_v63  ;;  %v2375_v58 = vld [vmem:[%s3020_s5 + $0x38] sm:$0xff]   ;;  %2281 = vmatpush3.bf16.msra.mxu1 %v2376_v59 }
 0x135   : > { %v2463_v10 = vpop.eup %2462  ;;  %2480 = vrcp.f32 %v815_v3  ;;  %v816_v11 = vadd.f32 1.0, %v2461_v6  ;;  %v686_v13 = vadd.f32 %v2802_v39, %v685_v9  ;;  %2213 = vmatmul.mubr.bf16.gmra.mrb[12].mxu1 %v913_v61  ;;  %v1975_v15 = vmul.f32 -1.442695, %v683_v4  ;;  %2246 = vmatprep.subr.bf16.mxu0 %v2375_v58  ;;  %v2378_v61 = vld [vmem:[%s3022_s7 + $0x10] sm:$0xff]  }
 0x136   : > { %2482 = vrcp.f32 %v813_v7  ;;  %v814_v14 = vadd.f32 1.0, %v2463_v10  ;;  %v1978_v17 = vmul.f32 -1.442695, %v694_v8  ;;  %2247 = vmatpush3.bf16.msra.mxu0 %v2375_v58  ;;  %2282 = vmatprep.subr.bf16.mxu1 %v2377_v60 }
 0x137   : > { %v2465_v16 = vpop.eup %2464  ;;  %2484 = vrcp.f32 %v816_v11  ;;  %v1976_v19 = vmul.f32 -1.442695, %v686_v13 }
 0x138   : > { %v2467_v18 = vpop.eup %2466  ;;  %2486 = vrcp.f32 %v814_v14  ;;  %2283 = vmatpush3.bf16.msra.mxu1 %v2377_v60 }
 0x139   : > { %v2469_v20 = vpop.eup %2468  ;;  %2488 = vpow2.f32 %v1977_v12  ;;  %2284 = vmatprep.subr.bf16.mxu1 %v2378_v61 }
 0x13a   : > { %v2471_v21 = vpop.eup %2470  ;;  %2490 = vpow2.f32 %v1975_v15  ;;  %v915_v22 = vpack.c.bf16 %v2469_v20, %v2465_v16 }
 0x13b   : > { %v2473_v23 = vpop.eup %2472  ;;  %2492 = vpow2.f32 %v1978_v17  ;;  %v914_v24 = vpack.c.bf16 %v2471_v21, %v2467_v18 }
 0x13c   : > { %v2475_v25 = vpop.eup %2474  ;;  %v819_v39 = vadd.f32 1.0, %v2473_v23  ;;  %2494 = vpow2.f32 %v1976_v19  ;;  %2285 = vmatpush3.bf16.msra.mxu1 %v2378_v61 }
 0x13d   : > { %v2477_v26 = vpop.eup %2476  ;;  %v817_v27 = vadd.f32 1.0, %v2475_v25  ;;  %2216 = vmatprep.mubr.bf16.mxu1 %v914_v24  ;;  %2286 = vmatprep.subr.bf16.mxu1 %v2379_v62 }
 0x13e   : > { %v2479_v28 = vpop.eup %2478  ;;  %2496 = vrcp.f32 %v819_v39  ;;  %v820_v29 = vadd.f32 1.0, %v2477_v26  ;;  %2217 = vmatmul.mubr.bf16.gmra.mrb[16].mxu1 %v915_v22 }
 0x13f   : > { %v2481_v30 = vpop.eup %2480  ;;  %2498 = vrcp.f32 %v817_v27  ;;  %v818_v31 = vadd.f32 1.0, %v2479_v28 }
 0x140   : > { %v2483_v32 = vpop.eup %2482  ;;  %2500 = vrcp.f32 %v820_v29  ;;  %2287 = vmatpush3.bf16.msra.mxu1 %v2379_v62 }
 0x141   : > { %v2485_v33 = vpop.eup %2484  ;;  %2502 = vrcp.f32 %v818_v31 }
 0x142   : > { %v2487_v34 = vpop.eup %2486  ;;  %v917_v35 = vpack.c.bf16 %v2485_v33, %v2481_v30 }
 0x143   : > { %v2489_v36 = vpop.eup %2488  ;;  %v916_v37 = vpack.c.bf16 %v2487_v34, %v2483_v32 }
 0x144   : > { %v2491_v38 = vpop.eup %2490  ;;  %v823_v40 = vadd.f32 1.0, %v2489_v36 }
 0x145   : > { %v2493_v41 = vpop.eup %2492  ;;  %v821_v42 = vadd.f32 1.0, %v2491_v38  ;;  %2220 = vmatprep.mubr.bf16.mxu1 %v916_v37 }
 0x146   : > { %v2495_v43 = vpop.eup %2494  ;;  %2504 = vrcp.f32 %v823_v40  ;;  %v824_v44 = vadd.f32 1.0, %v2493_v41  ;;  %2221 = vmatmul.mubr.bf16.gmra.mrb[20].mxu1 %v917_v35 }
 0x147   : > { %2506 = vrcp.f32 %v821_v42  ;;  %v822_v45 = vadd.f32 1.0, %v2495_v43 }
 0x148   : > { %v2497_v46 = vpop.eup %2496  ;;  %2508 = vrcp.f32 %v824_v44 }
 0x149   : > { %v2499_v47 = vpop.eup %2498  ;;  %2510 = vrcp.f32 %v822_v45 }
 0x14a   : > { %v2501_v48 = vpop.eup %2500 }
 0x14b   : > { %v2503_v49 = vpop.eup %2502  ;;  %v919_v50 = vpack.c.bf16 %v2501_v48, %v2497_v46 }
 0x14c   : > { %v918_v51 = vpack.c.bf16 %v2503_v49, %v2499_v47 }
 0x14e   : > { %2224 = vmatprep.mubr.bf16.mxu1 %v918_v51 }
 0x14f   : > { %2225 = vmatmul.mubr.bf16.gmra.mrb[24].mxu1 %v919_v50 }
 0x150   : > { %v2505_v52 = vpop.eup %2504 }
 0x151   : > { %v2507_v53 = vpop.eup %2506 }
 0x152   : > { %v2509_v54 = vpop.eup %2508 }
 0x153   : > { %v2511_v55 = vpop.eup %2510  ;;  %v921_v56 = vpack.c.bf16 %v2509_v54, %v2505_v52 }
 0x154   : > { %v920_v57 = vpack.c.bf16 %v2511_v55, %v2507_v53 }
 0x156   : > { %2228 = vmatprep.mubr.bf16.mxu1 %v920_v57 }
 0x157   : > { %2229 = vmatmul.mubr.bf16.gmra.mrb[28].mxu1 %v921_v56 }
 0x1ef   : > { %v2202_v63 = vpop.f32.mrb[0].mxu1 }
 0x1f0   : > { %v1010_v1 = vpop.f32.mrb[1].mxu1  ;;  %v1019_v3 = vadd.f32 %v2202_v63, %v2854_v0 }
 0x1f1   : > { %v2203_v2 = vpop.f32.mrb[2].mxu1  ;;  %v1011_v6 = vadd.f32 %v2854_v0, %v1010_v1 }
 0x1f2   : > { %v1022_v4 = vadd.f32 %v2203_v2, %v2854_v0  ;;  %v1013_v5 = vpop.f32.mrb[3].mxu1 }
 0x1f3   : > { %v1014_v7 = vadd.f32 %v2854_v0, %v1013_v5 }
 0x1f4   : > { %v1155_v8 = vpack.c.bf16 %v1022_v4, %v1019_v3 }
 0x1f5   : > { %v1154_v9 = vpack.c.bf16 %v1014_v7, %v1011_v6 }
 0x1f7   : > { %v2206_v10 = vpop.f32.mrb[4].mxu1  ;;  %2248 = vmatprep.mubr.bf16.mxu0 %v1154_v9 }
 0x1f8   : > { %v1026_v11 = vpop.f32.mrb[5].mxu1  ;;  %2249 = vmatmul.mubr.bf16.vlgmr.msra.gmra.mrb[32].mxu0 %v1155_v8  ;;  %v1035_v13 = vadd.f32 %v2206_v10, %v2854_v0 }
 0x1f9   : > { %v2207_v12 = vpop.f32.mrb[6].mxu1  ;;  %v1027_v16 = vadd.f32 %v2854_v0, %v1026_v11 }
 0x1fa   : > { %v1038_v14 = vadd.f32 %v2207_v12, %v2854_v0  ;;  %v1029_v15 = vpop.f32.mrb[7].mxu1 }
 0x1fb   : > { %v1030_v17 = vadd.f32 %v2854_v0, %v1029_v15 }
 0x1fc   : > { %v1157_v18 = vpack.c.bf16 %v1038_v14, %v1035_v13 }
 0x1fd   : > { %v1156_v19 = vpack.c.bf16 %v1030_v17, %v1027_v16  ;;  %v2380_v17 = vld [vmem:[%s3022_s7 + $0x20] sm:$0xff]  }
 0x1fe   : > { %2288 = vmatprep.subr.bf16.mxu1 %v2380_v17 }
 0x1ff   : > { %2252 = vmatprep.mubr.bf16.mxu0 %v1156_v19  ;;  %2289 = vmatpush3.bf16.msra.mxu1 %v2380_v17  ;;  %v2383_v19 = vld [vmem:[%s3022_s7 + $0x38] sm:$0xff]  }
 0x200   : > { %v2210_v20 = vpop.f32.mrb[8].mxu1  ;;  %2253 = vmatmul.mubr.bf16.gmra.mrb[36].mxu0 %v1157_v18  ;;  %v2381_v18 = vld [vmem:[%s3022_s7 + $0x28] sm:$0xff]  }
 0x201   : > { %v1042_v21 = vpop.f32.mrb[9].mxu1  ;;  %v1051_v23 = vadd.f32 %v2210_v20, %v2854_v0  ;;  %2290 = vmatprep.subr.bf16.mxu1 %v2381_v18  ;;  %v2903_v20 = vld [vmem:[%s3021_s6] ss:$0 sm:$0xff] }
 0x202   : > { %v2211_v22 = vpop.f32.mrb[10].mxu1  ;;  %v1043_v39 = vadd.f32 %v2854_v0, %v1042_v21 }
 0x203   : > { %v1054_v24 = vadd.f32 %v2211_v22, %v2854_v0  ;;  %v1045_v25 = vpop.f32.mrb[11].mxu1  ;;  %2291 = vmatpush3.bf16.msra.mxu1 %v2381_v18 }
 0x204   : > { %v1046_v26 = vadd.f32 %v2854_v0, %v1045_v25 }
 0x205   : > { %v1159_v27 = vpack.c.bf16 %v1054_v24, %v1051_v23 }
 0x206   : > { %v1158_v28 = vpack.c.bf16 %v1046_v26, %v1043_v39 }
 0x208   : > { %v2214_v29 = vpop.f32.mrb[12].mxu1  ;;  %2256 = vmatprep.mubr.bf16.mxu0 %v1158_v28 }
 0x209   : > { %v1058_v30 = vpop.f32.mrb[13].mxu1  ;;  %2257 = vmatmul.mubr.bf16.gmra.mrb[40].mxu0 %v1159_v27  ;;  %v1067_v32 = vadd.f32 %v2214_v29, %v2854_v0 }
 0x20a   : > { %v2215_v31 = vpop.f32.mrb[14].mxu1  ;;  %v1059_v35 = vadd.f32 %v2854_v0, %v1058_v30 }
 0x20b   : > { %v1070_v33 = vadd.f32 %v2215_v31, %v2854_v0  ;;  %v1061_v34 = vpop.f32.mrb[15].mxu1 }
 0x20c   : > { %v1062_v36 = vadd.f32 %v2854_v0, %v1061_v34 }
 0x20d   : > { %v1161_v37 = vpack.c.bf16 %v1070_v33, %v1067_v32 }
 0x20e   : > { %v1160_v38 = vpack.c.bf16 %v1062_v36, %v1059_v35 }
 0x210   : > { %2260 = vmatprep.mubr.bf16.mxu0 %v1160_v38 }
 0x211   : > { %v2218_v40 = vpop.f32.mrb[16].mxu1  ;;  %2261 = vmatmul.mubr.bf16.gmra.mrb[44].mxu0 %v1161_v37 }
 0x212   : > { %v1074_v41 = vpop.f32.mrb[17].mxu1  ;;  %v1083_v43 = vadd.f32 %v2218_v40, %v2854_v0 }
 0x213   : > { %v2219_v42 = vpop.f32.mrb[18].mxu1  ;;  %v1075_v46 = vadd.f32 %v2854_v0, %v1074_v41 }
 0x214   : > { %v1086_v44 = vadd.f32 %v2219_v42, %v2854_v0  ;;  %v1077_v45 = vpop.f32.mrb[19].mxu1 }
 0x215   : > { %v1078_v47 = vadd.f32 %v2854_v0, %v1077_v45 }
 0x216   : > { %v1163_v48 = vpack.c.bf16 %v1086_v44, %v1083_v43 }
 0x217   : > { %v1162_v49 = vpack.c.bf16 %v1078_v47, %v1075_v46 }
 0x219   : > { %v2222_v50 = vpop.f32.mrb[20].mxu1  ;;  %2264 = vmatprep.mubr.bf16.mxu0 %v1162_v49 }
 0x21a   : > { %v1090_v51 = vpop.f32.mrb[21].mxu1  ;;  %2265 = vmatmul.mubr.bf16.gmra.mrb[48].mxu0 %v1163_v48  ;;  %v1099_v53 = vadd.f32 %v2222_v50, %v2854_v0 }
 0x21b   : > { %v2223_v52 = vpop.f32.mrb[22].mxu1  ;;  %v1091_v56 = vadd.f32 %v2854_v0, %v1090_v51 }
 0x21c   : > { %v1102_v54 = vadd.f32 %v2223_v52, %v2854_v0  ;;  %v1093_v55 = vpop.f32.mrb[23].mxu1 }
 0x21d   : > { %v1094_v57 = vadd.f32 %v2854_v0, %v1093_v55 }
 0x21e   : > { %v1165_v58 = vpack.c.bf16 %v1102_v54, %v1099_v53 }
 0x21f   : > { %v1164_v59 = vpack.c.bf16 %v1094_v57, %v1091_v56 }
 0x221   : > { %2268 = vmatprep.mubr.bf16.mxu0 %v1164_v59 }
 0x222   : > { %v2226_v60 = vpop.f32.mrb[24].mxu1  ;;  %2269 = vmatmul.mubr.bf16.gmra.mrb[52].mxu0 %v1165_v58 }
 0x223   : > { %v1106_v61 = vpop.f32.mrb[25].mxu1  ;;  %v1115_v63 = vadd.f32 %v2226_v60, %v2854_v0 }
 0x224   : > { %v2227_v62 = vpop.f32.mrb[26].mxu1  ;;  %v1107_v3 = vadd.f32 %v2854_v0, %v1106_v61 }
 0x225   : > { %v1118_v1 = vadd.f32 %v2227_v62, %v2854_v0  ;;  %v1109_v2 = vpop.f32.mrb[27].mxu1 }
 0x226   : > { %v1110_v4 = vadd.f32 %v2854_v0, %v1109_v2 }
 0x227   : > { %v1167_v5 = vpack.c.bf16 %v1118_v1, %v1115_v63 }
 0x228   : > { %v1166_v6 = vpack.c.bf16 %v1110_v4, %v1107_v3 }
 0x22a   : > { %v2230_v7 = vpop.f32.mrb[28].mxu1  ;;  %2272 = vmatprep.mubr.bf16.mxu0 %v1166_v6 }
 0x22b   : > { %v1122_v8 = vpop.f32.mrb[29].mxu1  ;;  %2273 = vmatmul.mubr.bf16.gmra.mrb[56].mxu0 %v1167_v5  ;;  %v1131_v10 = vadd.f32 %v2230_v7, %v2854_v0 }
 0x22c   : > { %v2231_v9 = vpop.f32.mrb[30].mxu1  ;;  %v1123_v13 = vadd.f32 %v2854_v0, %v1122_v8 }
 0x22d   : > { %v1134_v11 = vadd.f32 %v2231_v9, %v2854_v0  ;;  %v1125_v12 = vpop.f32.mrb[31].mxu1 }
 0x22e   : > { %v1126_v14 = vadd.f32 %v2854_v0, %v1125_v12  ;;  %v2382_v0 = vld [vmem:[%s3022_s7 + $0x30] sm:$0xff]  }
 0x22f   : > { %v1169_v15 = vpack.c.bf16 %v1134_v11, %v1131_v10  ;;  %2292 = vmatprep.subr.bf16.mxu1 %v2382_v0 }
 0x230   : > { %v1168_v16 = vpack.c.bf16 %v1126_v14, %v1123_v13  ;;  %2293 = vmatpush3.bf16.msra.mxu1 %v2382_v0 }
 0x231   : > { %2294 = vmatprep.subr.bf16.mxu1 %v2383_v19 }
 0x232   : > { %2276 = vmatprep.mubr.bf16.mxu0 %v1168_v16 }
 0x233   : > { %2277 = vmatmul.mubr.bf16.gmra.mrb[60].mxu0 %v1169_v15 }
 0x234   : > { %2295 = vmatpush3.bf16.msra.mxu1 %v2383_v19 }
 0x2cb   : > { %v2250_v21 = vpop.f32.mrb[32].mxu0 }
 0x2cc   : > { %v1267_v22 = vadd.f32 %v2250_v21, %v2903_v20  ;;  %v1258_v23 = vpop.f32.mrb[33].mxu0 }
 0x2cd   : > { %v1259_v24 = vadd.f32 %v2903_v20, %v1258_v23  ;;  %v2251_v25 = vpop.f32.mrb[34].mxu0 }
 0x2ce   : > { %v1999_v39 = vmul.f32 -1.442695, %v1267_v22  ;;  %v1270_v26 = vadd.f32 %v2251_v25, %v2903_v20  ;;  %v1261_v27 = vpop.f32.mrb[35].mxu0 }
 0x2cf   : > { %v1997_v28 = vmul.f32 -1.442695, %v1259_v24  ;;  %v1262_v29 = vadd.f32 %v2903_v20, %v1261_v27 }
 0x2d0   : > { %2512 = vpow2.f32 %v1999_v39  ;;  %v2000_v30 = vmul.f32 -1.442695, %v1270_v26 }
 0x2d1   : > { %2514 = vpow2.f32 %v1997_v28  ;;  %v1998_v31 = vmul.f32 -1.442695, %v1262_v29 }
 0x2d2   : > { %2516 = vpow2.f32 %v2000_v30 }
 0x2d3   : > { %2518 = vpow2.f32 %v1998_v31  ;;  %v2254_v32 = vpop.f32.mrb[36].mxu0 }
 0x2d4   : > { %v1283_v33 = vadd.f32 %v2254_v32, %v2903_v20  ;;  %v1274_v34 = vpop.f32.mrb[37].mxu0 }
 0x2d5   : > { %v1275_v35 = vadd.f32 %v2903_v20, %v1274_v34  ;;  %v2255_v36 = vpop.f32.mrb[38].mxu0 }
 0x2d6   : > { %v2003_v37 = vmul.f32 -1.442695, %v1283_v33  ;;  %v1286_v38 = vadd.f32 %v2255_v36, %v2903_v20  ;;  %v1277_v40 = vpop.f32.mrb[39].mxu0 }
 0x2d7   : > { %v2001_v41 = vmul.f32 -1.442695, %v1275_v35  ;;  %v1278_v42 = vadd.f32 %v2903_v20, %v1277_v40 }
 0x2d8   : > { %2520 = vpow2.f32 %v2003_v37  ;;  %v2004_v43 = vmul.f32 -1.442695, %v1286_v38 }
 0x2d9   : > { %2522 = vpow2.f32 %v2001_v41  ;;  %v2002_v44 = vmul.f32 -1.442695, %v1278_v42 }
 0x2da   : > { %v2513_v45 = vpop.eup %2512  ;;  %2524 = vpow2.f32 %v2004_v43 }
 0x2db   : > { %v2515_v46 = vpop.eup %2514  ;;  %v1483_v47 = vadd.f32 1.0, %v2513_v45  ;;  %2526 = vpow2.f32 %v2002_v44 }
 0x2dc   : > { %v2517_v48 = vpop.eup %2516  ;;  %v1481_v49 = vadd.f32 1.0, %v2515_v46  ;;  %v2258_v50 = vpop.f32.mrb[40].mxu0 }
 0x2dd   : > { %v2519_v51 = vpop.eup %2518  ;;  %2528 = vrcp.f32 %v1483_v47  ;;  %v1484_v52 = vadd.f32 1.0, %v2517_v48  ;;  %v1299_v53 = vadd.f32 %v2258_v50, %v2903_v20  ;;  %v1290_v54 = vpop.f32.mrb[41].mxu0 }
 0x2de   : > { %2530 = vrcp.f32 %v1481_v49  ;;  %v1482_v55 = vadd.f32 1.0, %v2519_v51  ;;  %v1291_v56 = vadd.f32 %v2903_v20, %v1290_v54  ;;  %v2259_v57 = vpop.f32.mrb[42].mxu0 }
 0x2df   : > { %2532 = vrcp.f32 %v1484_v52  ;;  %v2007_v58 = vmul.f32 -1.442695, %v1299_v53  ;;  %v1302_v59 = vadd.f32 %v2259_v57, %v2903_v20  ;;  %v1293_v60 = vpop.f32.mrb[43].mxu0 }
 0x2e0   : > { %2534 = vrcp.f32 %v1482_v55  ;;  %v2005_v61 = vmul.f32 -1.442695, %v1291_v56  ;;  %v1294_v62 = vadd.f32 %v2903_v20, %v1293_v60 }
 0x2e1   : > { %2536 = vpow2.f32 %v2007_v58  ;;  %v2008_v63 = vmul.f32 -1.442695, %v1302_v59 }
 0x2e2   : > { %v2521_v1 = vpop.eup %2520  ;;  %2538 = vpow2.f32 %v2005_v61  ;;  %v2006_v2 = vmul.f32 -1.442695, %v1294_v62 }
 0x2e3   : > { %v2523_v3 = vpop.eup %2522  ;;  %v1487_v4 = vadd.f32 1.0, %v2521_v1  ;;  %2540 = vpow2.f32 %v2008_v63 }
 0x2e4   : > { %v2525_v5 = vpop.eup %2524  ;;  %v1485_v6 = vadd.f32 1.0, %v2523_v3  ;;  %2542 = vpow2.f32 %v2006_v2  ;;  %v2262_v7 = vpop.f32.mrb[44].mxu0 }
 0x2e5   : > { %v2527_v8 = vpop.eup %2526  ;;  %2544 = vrcp.f32 %v1487_v4  ;;  %v1488_v9 = vadd.f32 1.0, %v2525_v5  ;;  %v1315_v10 = vadd.f32 %v2262_v7, %v2903_v20  ;;  %v1306_v11 = vpop.f32.mrb[45].mxu0 }
 0x2e6   : > { %2546 = vrcp.f32 %v1485_v6  ;;  %v1486_v12 = vadd.f32 1.0, %v2527_v8  ;;  %v1307_v13 = vadd.f32 %v2903_v20, %v1306_v11  ;;  %v2263_v14 = vpop.f32.mrb[46].mxu0 }
 0x2e7   : > { %v2529_v15 = vpop.eup %2528  ;;  %2548 = vrcp.f32 %v1488_v9  ;;  %v2011_v16 = vmul.f32 -1.442695, %v1315_v10  ;;  %v1318_v17 = vadd.f32 %v2263_v14, %v2903_v20  ;;  %v1309_v18 = vpop.f32.mrb[47].mxu0 }
 0x2e8   : > { %v2531_v0 = vpop.eup %2530  ;;  %2550 = vrcp.f32 %v1486_v12  ;;  %v2009_v19 = vmul.f32 -1.442695, %v1307_v13  ;;  %v1310_v21 = vadd.f32 %v2903_v20, %v1309_v18 }
 0x2e9   : > { %v2533_v22 = vpop.eup %2532  ;;  %2552 = vpow2.f32 %v2011_v16  ;;  %v2012_v23 = vmul.f32 -1.442695, %v1318_v17 }
 0x2ea   : > { %v2535_v24 = vpop.eup %2534  ;;  %2554 = vpow2.f32 %v2009_v19  ;;  %v2010_v25 = vmul.f32 -1.442695, %v1310_v21  ;;  %v1595_v39 = vpack.c.bf16 %v2533_v22, %v2529_v15 }
 0x2eb   : > { %v2537_v26 = vpop.eup %2536  ;;  %2556 = vpow2.f32 %v2012_v23  ;;  %v1594_v27 = vpack.c.bf16 %v2535_v24, %v2531_v0 }
 0x2ec   : > { %v2539_v28 = vpop.eup %2538  ;;  %v1491_v29 = vadd.f32 1.0, %v2537_v26  ;;  %2558 = vpow2.f32 %v2010_v25 }
 0x2ed   : > { %v2541_v30 = vpop.eup %2540  ;;  %v1489_v31 = vadd.f32 1.0, %v2539_v28  ;;  %v2266_v32 = vpop.f32.mrb[48].mxu0  ;;  %2296 = vmatprep.mubr.bf16.mxu1 %v1594_v27 }
 0x2ee   : > { %v2543_v33 = vpop.eup %2542  ;;  %2560 = vrcp.f32 %v1491_v29  ;;  %v1492_v34 = vadd.f32 1.0, %v2541_v30  ;;  %v1331_v35 = vadd.f32 %v2266_v32, %v2903_v20  ;;  %v1322_v36 = vpop.f32.mrb[49].mxu0  ;;  %2297 = vmatmul.mubr.bf16.vlgmr.msra.gmra.mrb[32].mxu1 %v1595_v39 }
 0x2ef   : > { %v2545_v37 = vpop.eup %2544  ;;  %2562 = vrcp.f32 %v1489_v31  ;;  %v1490_v38 = vadd.f32 1.0, %v2543_v33  ;;  %v1323_v40 = vadd.f32 %v2903_v20, %v1322_v36  ;;  %v2267_v41 = vpop.f32.mrb[50].mxu0 }
 0x2f0   : > { %v2547_v42 = vpop.eup %2546  ;;  %2564 = vrcp.f32 %v1492_v34  ;;  %v2015_v43 = vmul.f32 -1.442695, %v1331_v35  ;;  %v1334_v44 = vadd.f32 %v2267_v41, %v2903_v20  ;;  %v1325_v45 = vpop.f32.mrb[51].mxu0 }
 0x2f1   : > { %v2549_v46 = vpop.eup %2548  ;;  %2566 = vrcp.f32 %v1490_v38  ;;  %v2013_v47 = vmul.f32 -1.442695, %v1323_v40  ;;  %v1326_v48 = vadd.f32 %v2903_v20, %v1325_v45 }
 0x2f2   : > { %v2551_v49 = vpop.eup %2550  ;;  %2568 = vpow2.f32 %v2015_v43  ;;  %v2016_v50 = vmul.f32 -1.442695, %v1334_v44  ;;  %v1597_v51 = vpack.c.bf16 %v2549_v46, %v2545_v37 }
 0x2f3   : > { %v2553_v52 = vpop.eup %2552  ;;  %2570 = vpow2.f32 %v2013_v47  ;;  %v2014_v53 = vmul.f32 -1.442695, %v1326_v48  ;;  %v1596_v54 = vpack.c.bf16 %v2551_v49, %v2547_v42 }
 0x2f4   : > { %v2555_v55 = vpop.eup %2554  ;;  %v1495_v56 = vadd.f32 1.0, %v2553_v52  ;;  %2572 = vpow2.f32 %v2016_v50 }
 0x2f5   : > { %v2557_v57 = vpop.eup %2556  ;;  %v1493_v58 = vadd.f32 1.0, %v2555_v55  ;;  %2574 = vpow2.f32 %v2014_v53  ;;  %v2270_v59 = vpop.f32.mrb[52].mxu0  ;;  %2300 = vmatprep.mubr.bf16.mxu1 %v1596_v54 }
 0x2f6   : > { %v2559_v60 = vpop.eup %2558  ;;  %2576 = vrcp.f32 %v1495_v56  ;;  %v1496_v61 = vadd.f32 1.0, %v2557_v57  ;;  %v1347_v62 = vadd.f32 %v2270_v59, %v2903_v20  ;;  %v1338_v63 = vpop.f32.mrb[53].mxu0  ;;  %2301 = vmatmul.mubr.bf16.gmra.mrb[36].mxu1 %v1597_v51 }
 0x2f7   : > { %2578 = vrcp.f32 %v1493_v58  ;;  %v1494_v1 = vadd.f32 1.0, %v2559_v60  ;;  %v1339_v2 = vadd.f32 %v2903_v20, %v1338_v63  ;;  %v2271_v3 = vpop.f32.mrb[54].mxu0 }
 0x2f8   : > { %v2561_v4 = vpop.eup %2560  ;;  %2580 = vrcp.f32 %v1496_v61  ;;  %v2019_v5 = vmul.f32 -1.442695, %v1347_v62  ;;  %v1350_v6 = vadd.f32 %v2271_v3, %v2903_v20  ;;  %v1341_v7 = vpop.f32.mrb[55].mxu0 }
 0x2f9   : > { %v2563_v8 = vpop.eup %2562  ;;  %2582 = vrcp.f32 %v1494_v1  ;;  %v2017_v9 = vmul.f32 -1.442695, %v1339_v2  ;;  %v1342_v10 = vadd.f32 %v2903_v20, %v1341_v7 }
 0x2fa   : > { %v2565_v11 = vpop.eup %2564  ;;  %2584 = vpow2.f32 %v2019_v5  ;;  %v2020_v12 = vmul.f32 -1.442695, %v1350_v6 }
 0x2fb   : > { %v2567_v13 = vpop.eup %2566  ;;  %2586 = vpow2.f32 %v2017_v9  ;;  %v2018_v14 = vmul.f32 -1.442695, %v1342_v10  ;;  %v1599_v15 = vpack.c.bf16 %v2565_v11, %v2561_v4 }
 0x2fc   : > { %v2569_v16 = vpop.eup %2568  ;;  %2588 = vpow2.f32 %v2020_v12  ;;  %v1598_v17 = vpack.c.bf16 %v2567_v13, %v2563_v8 }
 0x2fd   : > { %v2571_v18 = vpop.eup %2570  ;;  %v1499_v0 = vadd.f32 1.0, %v2569_v16  ;;  %2590 = vpow2.f32 %v2018_v14 }
 0x2fe   : > { %v2573_v19 = vpop.eup %2572  ;;  %v1497_v21 = vadd.f32 1.0, %v2571_v18  ;;  %v2274_v22 = vpop.f32.mrb[56].mxu0  ;;  %2304 = vmatprep.mubr.bf16.mxu1 %v1598_v17 }
 0x2ff   : > { %v2575_v23 = vpop.eup %2574  ;;  %2592 = vrcp.f32 %v1499_v0  ;;  %v1500_v24 = vadd.f32 1.0, %v2573_v19  ;;  %v1363_v25 = vadd.f32 %v2274_v22, %v2903_v20  ;;  %v1354_v39 = vpop.f32.mrb[57].mxu0  ;;  %2305 = vmatmul.mubr.bf16.gmra.mrb[40].mxu1 %v1599_v15 }
 0x300   : > { %v2577_v26 = vpop.eup %2576  ;;  %2594 = vrcp.f32 %v1497_v21  ;;  %v1498_v27 = vadd.f32 1.0, %v2575_v23  ;;  %v1355_v28 = vadd.f32 %v2903_v20, %v1354_v39  ;;  %v2275_v29 = vpop.f32.mrb[58].mxu0 }
 0x301   : > { %v2579_v30 = vpop.eup %2578  ;;  %2596 = vrcp.f32 %v1500_v24  ;;  %v2023_v31 = vmul.f32 -1.442695, %v1363_v25  ;;  %v1366_v32 = vadd.f32 %v2275_v29, %v2903_v20  ;;  %v1357_v33 = vpop.f32.mrb[59].mxu0 }
 0x302   : > { %v2581_v34 = vpop.eup %2580  ;;  %2598 = vrcp.f32 %v1498_v27  ;;  %v2021_v35 = vmul.f32 -1.442695, %v1355_v28  ;;  %v1358_v36 = vadd.f32 %v2903_v20, %v1357_v33 }
 0x303   : > { %v2583_v37 = vpop.eup %2582  ;;  %2600 = vpow2.f32 %v2023_v31  ;;  %v2024_v38 = vmul.f32 -1.442695, %v1366_v32  ;;  %v1601_v40 = vpack.c.bf16 %v2581_v34, %v2577_v26 }
 0x304   : > { %v2585_v41 = vpop.eup %2584  ;;  %2602 = vpow2.f32 %v2021_v35  ;;  %v2022_v42 = vmul.f32 -1.442695, %v1358_v36  ;;  %v1600_v43 = vpack.c.bf16 %v2583_v37, %v2579_v30 }
 0x305   : > { %v2587_v44 = vpop.eup %2586  ;;  %v1503_v45 = vadd.f32 1.0, %v2585_v41  ;;  %2604 = vpow2.f32 %v2024_v38  ;;  %v2941_v38 = vld [vmem:[%s3023_s8] ss:$0 sm:$0xff] }
 0x306   : > { %v2589_v46 = vpop.eup %2588  ;;  %v1501_v47 = vadd.f32 1.0, %v2587_v44  ;;  %2606 = vpow2.f32 %v2022_v42  ;;  %v2278_v48 = vpop.f32.mrb[60].mxu0  ;;  %2308 = vmatprep.mubr.bf16.mxu1 %v1600_v43 }
 0x307   : > { %v2591_v49 = vpop.eup %2590  ;;  %2608 = vrcp.f32 %v1503_v45  ;;  %v1504_v50 = vadd.f32 1.0, %v2589_v46  ;;  %v1379_v51 = vadd.f32 %v2278_v48, %v2903_v20  ;;  %v1370_v52 = vpop.f32.mrb[61].mxu0  ;;  %2309 = vmatmul.mubr.bf16.gmra.mrb[44].mxu1 %v1601_v40 }
 0x308   : > { %2610 = vrcp.f32 %v1501_v47  ;;  %v1502_v53 = vadd.f32 1.0, %v2591_v49  ;;  %v1371_v54 = vadd.f32 %v2903_v20, %v1370_v52  ;;  %v2279_v55 = vpop.f32.mrb[62].mxu0 }
 0x309   : > { %v2593_v56 = vpop.eup %2592  ;;  %2612 = vrcp.f32 %v1504_v50  ;;  %v2027_v57 = vmul.f32 -1.442695, %v1379_v51  ;;  %v1382_v58 = vadd.f32 %v2279_v55, %v2903_v20  ;;  %v1373_v59 = vpop.f32.mrb[63].mxu0 }
 0x30a   : > { %v2595_v60 = vpop.eup %2594  ;;  %2614 = vrcp.f32 %v1502_v53  ;;  %v2025_v61 = vmul.f32 -1.442695, %v1371_v54  ;;  %v1374_v62 = vadd.f32 %v2903_v20, %v1373_v59 }
 0x30b   : > { %v2597_v63 = vpop.eup %2596  ;;  %2616 = vpow2.f32 %v2027_v57  ;;  %v2028_v1 = vmul.f32 -1.442695, %v1382_v58 }
 0x30c   : > { %v2599_v2 = vpop.eup %2598  ;;  %2618 = vpow2.f32 %v2025_v61  ;;  %v2026_v3 = vmul.f32 -1.442695, %v1374_v62  ;;  %v1603_v4 = vpack.c.bf16 %v2597_v63, %v2593_v56 }
 0x30d   : > { %v2601_v5 = vpop.eup %2600  ;;  %2620 = vpow2.f32 %v2028_v1  ;;  %v1602_v6 = vpack.c.bf16 %v2599_v2, %v2595_v60 }
 0x30e   : > { %v2603_v7 = vpop.eup %2602  ;;  %v1507_v8 = vadd.f32 1.0, %v2601_v5  ;;  %2622 = vpow2.f32 %v2026_v3 }
 0x30f   : > { %v2605_v9 = vpop.eup %2604  ;;  %v1505_v10 = vadd.f32 1.0, %v2603_v7  ;;  %2312 = vmatprep.mubr.bf16.mxu1 %v1602_v6 }
 0x310   : > { %v2607_v11 = vpop.eup %2606  ;;  %2624 = vrcp.f32 %v1507_v8  ;;  %v1508_v12 = vadd.f32 1.0, %v2605_v9  ;;  %2313 = vmatmul.mubr.bf16.gmra.mrb[48].mxu1 %v1603_v4 }
 0x311   : > { %v2609_v20 = vpop.eup %2608  ;;  %2626 = vrcp.f32 %v1505_v10  ;;  %v1506_v13 = vadd.f32 1.0, %v2607_v11 }
 0x312   : > { %v2611_v14 = vpop.eup %2610  ;;  %2628 = vrcp.f32 %v1508_v12 }
 0x313   : > { %v2613_v15 = vpop.eup %2612  ;;  %2630 = vrcp.f32 %v1506_v13 }
 0x314   : > { %v2615_v16 = vpop.eup %2614  ;;  %v1605_v17 = vpack.c.bf16 %v2613_v15, %v2609_v20 }
 0x315   : > { %v2617_v18 = vpop.eup %2616  ;;  %v1604_v0 = vpack.c.bf16 %v2615_v16, %v2611_v14 }
 0x316   : > { %v2619_v19 = vpop.eup %2618  ;;  %v1511_v21 = vadd.f32 1.0, %v2617_v18 }
 0x317   : > { %v2621_v22 = vpop.eup %2620  ;;  %v1509_v23 = vadd.f32 1.0, %v2619_v19  ;;  %2316 = vmatprep.mubr.bf16.mxu1 %v1604_v0 }
 0x318   : > { %v2623_v24 = vpop.eup %2622  ;;  %2632 = vrcp.f32 %v1511_v21  ;;  %v1512_v25 = vadd.f32 1.0, %v2621_v22  ;;  %2317 = vmatmul.mubr.bf16.gmra.mrb[52].mxu1 %v1605_v17 }
 0x319   : > { %2634 = vrcp.f32 %v1509_v23  ;;  %v1510_v39 = vadd.f32 1.0, %v2623_v24 }
 0x31a   : > { %v2625_v26 = vpop.eup %2624  ;;  %2636 = vrcp.f32 %v1512_v25 }
 0x31b   : > { %v2627_v27 = vpop.eup %2626  ;;  %2638 = vrcp.f32 %v1510_v39 }
 0x31c   : > { %v2629_v28 = vpop.eup %2628 }
 0x31d   : > { %v2631_v29 = vpop.eup %2630  ;;  %v1607_v30 = vpack.c.bf16 %v2629_v28, %v2625_v26 }
 0x31e   : > { %v1606_v31 = vpack.c.bf16 %v2631_v29, %v2627_v27 }
 0x320   : > { %2320 = vmatprep.mubr.bf16.mxu1 %v1606_v31 }
 0x321   : > { %2321 = vmatmul.mubr.bf16.gmra.mrb[56].mxu1 %v1607_v30 }
 0x322   : > { %v2633_v32 = vpop.eup %2632 }
 0x323   : > { %v2635_v33 = vpop.eup %2634 }
 0x324   : > { %v2637_v34 = vpop.eup %2636 }
 0x325   : > { %v2639_v35 = vpop.eup %2638  ;;  %v1609_v36 = vpack.c.bf16 %v2637_v34, %v2633_v32 }
 0x326   : > { %v1608_v37 = vpack.c.bf16 %v2639_v35, %v2635_v33 }
 0x328   : > { %2324 = vmatprep.mubr.bf16.mxu1 %v1608_v37 }
 0x329   : > { %2325 = vmatmul.mubr.bf16.gmra.mrb[60].mxu1 %v1609_v36 }
 0x3c1   : > { %v2298_v40 = vpop.f32.mrb[32].mxu1 }
 0x3c2   : > { %v1707_v41 = vadd.f32 %v2298_v40, %v2941_v38  ;;  %v1698_v42 = vpop.f32.mrb[33].mxu1 }
 0x3c3   : > { %v1699_v43 = vadd.f32 %v2941_v38, %v1698_v42  ;;  %v2299_v44 = vpop.f32.mrb[34].mxu1 }
 0x3c4   : > { %1827 = vst [vmem:[%s2946_s15 + $0x10] sm:$0xff] %v1707_v41  ;;  %v1710_v45 = vadd.f32 %v2299_v44, %v2941_v38  ;;  %v1701_v46 = vpop.f32.mrb[35].mxu1 }
 0x3c5   : > { %1825 = vst [vmem:[%s2946_s15] sm:$0xff] %v1699_v43  ;;  %v1702_v47 = vadd.f32 %v2941_v38, %v1701_v46 }
 0x3c6   : > { %1828 = vst [vmem:[%s2946_s15 + $0x18] sm:$0xff] %v1710_v45 }
 0x3c7   : > { %1826 = vst [vmem:[%s2946_s15 + $0x8] sm:$0xff] %v1702_v47 }
 0x3c9   : > { %v2302_v48 = vpop.f32.mrb[36].mxu1 }
 0x3ca   : > { %v1723_v49 = vadd.f32 %v2302_v48, %v2941_v38  ;;  %v1714_v50 = vpop.f32.mrb[37].mxu1 }
 0x3cb   : > { %v1715_v51 = vadd.f32 %v2941_v38, %v1714_v50  ;;  %v2303_v52 = vpop.f32.mrb[38].mxu1 }
 0x3cc   : > { %1831 = vst [vmem:[%s2946_s15 + $0x30] sm:$0xff] %v1723_v49  ;;  %v1726_v53 = vadd.f32 %v2303_v52, %v2941_v38  ;;  %v1717_v54 = vpop.f32.mrb[39].mxu1 }
 0x3cd   : > { %1829 = vst [vmem:[%s2946_s15 + $0x20] sm:$0xff] %v1715_v51  ;;  %v1718_v55 = vadd.f32 %v2941_v38, %v1717_v54 }
 0x3ce   : > { %1832 = vst [vmem:[%s2946_s15 + $0x38] sm:$0xff] %v1726_v53 }
 0x3cf   : > { %1830 = vst [vmem:[%s2946_s15 + $0x28] sm:$0xff] %v1718_v55 }
 0x3d2   : > { %v2306_v56 = vpop.f32.mrb[40].mxu1 }
 0x3d3   : > { %v1739_v57 = vadd.f32 %v2306_v56, %v2941_v38  ;;  %v1730_v58 = vpop.f32.mrb[41].mxu1 }
 0x3d4   : > { %v1731_v59 = vadd.f32 %v2941_v38, %v1730_v58  ;;  %v2307_v60 = vpop.f32.mrb[42].mxu1 }
 0x3d5   : > { %1835 = vst [vmem:[%s2946_s15 + $0x50] sm:$0xff] %v1739_v57  ;;  %v1742_v61 = vadd.f32 %v2307_v60, %v2941_v38  ;;  %v1733_v62 = vpop.f32.mrb[43].mxu1 }
 0x3d6   : > { %1833 = vst [vmem:[%s2946_s15 + $0x40] sm:$0xff] %v1731_v59  ;;  %v1734_v63 = vadd.f32 %v2941_v38, %v1733_v62 }
 0x3d7   : > { %1836 = vst [vmem:[%s2946_s15 + $0x58] sm:$0xff] %v1742_v61 }
 0x3d8   : > { %1834 = vst [vmem:[%s2946_s15 + $0x48] sm:$0xff] %v1734_v63 }
 0x3da   : > { %v2310_v1 = vpop.f32.mrb[44].mxu1 }
 0x3db   : > { %v1755_v2 = vadd.f32 %v2310_v1, %v2941_v38  ;;  %v1746_v3 = vpop.f32.mrb[45].mxu1 }
 0x3dc   : > { %v1747_v4 = vadd.f32 %v2941_v38, %v1746_v3  ;;  %v2311_v5 = vpop.f32.mrb[46].mxu1 }
 0x3dd   : > { %1839 = vst [vmem:[%s2946_s15 + $0x70] sm:$0xff] %v1755_v2  ;;  %v1758_v6 = vadd.f32 %v2311_v5, %v2941_v38  ;;  %v1749_v7 = vpop.f32.mrb[47].mxu1 }
 0x3de   : > { %1837 = vst [vmem:[%s2946_s15 + $0x60] sm:$0xff] %v1747_v4  ;;  %v1750_v8 = vadd.f32 %v2941_v38, %v1749_v7 }
 0x3df   : > { %1840 = vst [vmem:[%s2946_s15 + $0x78] sm:$0xff] %v1758_v6 }
 0x3e0   : > { %1838 = vst [vmem:[%s2946_s15 + $0x68] sm:$0xff] %v1750_v8 }
 0x3e3   : > { %v2314_v9 = vpop.f32.mrb[48].mxu1 }
 0x3e4   : > { %v1771_v10 = vadd.f32 %v2314_v9, %v2941_v38  ;;  %v1762_v11 = vpop.f32.mrb[49].mxu1 }
 0x3e5   : > { %v1763_v12 = vadd.f32 %v2941_v38, %v1762_v11  ;;  %v2315_v20 = vpop.f32.mrb[50].mxu1 }
 0x3e6   : > { %1843 = vst [vmem:[%s2946_s15 + $0x90] sm:$0xff] %v1771_v10  ;;  %v1774_v13 = vadd.f32 %v2315_v20, %v2941_v38  ;;  %v1765_v14 = vpop.f32.mrb[51].mxu1 }
 0x3e7   : > { %1841 = vst [vmem:[%s2946_s15 + $0x80] sm:$0xff] %v1763_v12  ;;  %v1766_v15 = vadd.f32 %v2941_v38, %v1765_v14 }
 0x3e8   : > { %1844 = vst [vmem:[%s2946_s15 + $0x98] sm:$0xff] %v1774_v13 }
 0x3e9   : > { %1842 = vst [vmem:[%s2946_s15 + $0x88] sm:$0xff] %v1766_v15 }
 0x3eb   : > { %v2318_v16 = vpop.f32.mrb[52].mxu1 }
 0x3ec   : > { %v1787_v17 = vadd.f32 %v2318_v16, %v2941_v38  ;;  %v1778_v18 = vpop.f32.mrb[53].mxu1 }
 0x3ed   : > { %v1779_v0 = vadd.f32 %v2941_v38, %v1778_v18  ;;  %v2319_v19 = vpop.f32.mrb[54].mxu1 }
 0x3ee   : > { %1847 = vst [vmem:[%s2946_s15 + $0xb0] sm:$0xff] %v1787_v17  ;;  %v1790_v21 = vadd.f32 %v2319_v19, %v2941_v38  ;;  %v1781_v22 = vpop.f32.mrb[55].mxu1 }
 0x3ef   : > { %1845 = vst [vmem:[%s2946_s15 + $0xa0] sm:$0xff] %v1779_v0  ;;  %v1782_v23 = vadd.f32 %v2941_v38, %v1781_v22 }
 0x3f0   : > { %1848 = vst [vmem:[%s2946_s15 + $0xb8] sm:$0xff] %v1790_v21 }
 0x3f1   : > { %1846 = vst [vmem:[%s2946_s15 + $0xa8] sm:$0xff] %v1782_v23 }
 0x3f4   : > { %v2322_v24 = vpop.f32.mrb[56].mxu1 }
 0x3f5   : > { %v1803_v25 = vadd.f32 %v2322_v24, %v2941_v38  ;;  %v1794_v39 = vpop.f32.mrb[57].mxu1 }
 0x3f6   : > { %v1795_v26 = vadd.f32 %v2941_v38, %v1794_v39  ;;  %v2323_v27 = vpop.f32.mrb[58].mxu1 }
 0x3f7   : > { %1851 = vst [vmem:[%s2946_s15 + $0xd0] sm:$0xff] %v1803_v25  ;;  %v1806_v28 = vadd.f32 %v2323_v27, %v2941_v38  ;;  %v1797_v29 = vpop.f32.mrb[59].mxu1 }
 0x3f8   : > { %1849 = vst [vmem:[%s2946_s15 + $0xc0] sm:$0xff] %v1795_v26  ;;  %v1798_v30 = vadd.f32 %v2941_v38, %v1797_v29 }
 0x3f9   : > { %1852 = vst [vmem:[%s2946_s15 + $0xd8] sm:$0xff] %v1806_v28 }
 0x3fa   : > { %1850 = vst [vmem:[%s2946_s15 + $0xc8] sm:$0xff] %v1798_v30 }
 0x3fc   : > { %v2326_v31 = vpop.f32.mrb[60].mxu1 }
 0x3fd   : > { %v1819_v32 = vadd.f32 %v2326_v31, %v2941_v38  ;;  %v1810_v33 = vpop.f32.mrb[61].mxu1 }
 0x3fe   : > { %v1811_v34 = vadd.f32 %v2941_v38, %v1810_v33  ;;  %v2327_v35 = vpop.f32.mrb[62].mxu1 }
 0x3ff   : > { %1855 = vst [vmem:[%s2946_s15 + $0xf0] sm:$0xff] %v1819_v32  ;;  %v1822_v36 = vadd.f32 %v2327_v35, %v2941_v38  ;;  %v1813_v37 = vpop.f32.mrb[63].mxu1 }
 0x400   : > { %1853 = vst [vmem:[%s2946_s15 + $0xe0] sm:$0xff] %v1811_v34  ;;  %v1814_v40 = vadd.f32 %v2941_v38, %v1813_v37 }
 0x401   : > { %1856 = vst [vmem:[%s2946_s15 + $0xf8] sm:$0xff] %v1822_v36 }
 0x402   : > { %1854 = vst [vmem:[%s2946_s15 + $0xe8] sm:$0xff] %v1814_v40 }
 0x403 PF: > { %s19_s30 = sadd.s32 1, %s2646_s30  }
 0x404   : > { %p16_p4 = scmp.ge.s32.totalorder %s19_s30, 6  }
 0x406   :  { %18 = sbr.rel (!%p16_p4) target bundleno = 1 (0x1), region = 86 }

</bundles_post_ra>
